<compile_context>
chip_gen: v7x
topology: tpu7x:2x2x1
jax: 0.10.0
libtpu: 0.0.40
codegen_flags: <defaults>
</compile_context>

<pallas_src>
import math
import functools

import jax
import jax.numpy as jnp
from jax import lax
from jax.experimental import pallas as pl
from jax.experimental.pallas import tpu as pltpu


def build_positional_table(d_model: int, max_len: int = 150) -> jnp.ndarray:
    """Deterministic sin/cos table, shape (max_len, 1, d_model) — same values as
    the PyTorch buffer `pe` after unsqueeze(0).transpose(0, 1)."""
    position = jnp.arange(0, max_len, dtype=jnp.float32)[:, None]            # (L, 1)
    div_term = jnp.exp(
        jnp.arange(0, d_model, 2, dtype=jnp.float32) * (-math.log(10000.0) / d_model)
    )                                                                         # (D/2,)
    angles = position * div_term                                              # (L, D/2)
    pe = jnp.zeros((max_len, d_model), dtype=jnp.float32)
    pe = pe.at[:, 0::2].set(jnp.sin(angles))
    pe = pe.at[:, 1::2].set(jnp.cos(angles))
    return pe[:, None, :]                                                     # (L, 1, D)


def _pe_dropout_kernel(seed_ref, x_ref, pe_ref, o_ref, *, p_drop, training):
    # x_ref: (TS, B, D) VMEM tile, pe_ref: (TS, 1, D) VMEM tile,
    # seed_ref: (1,) int32 in SMEM.
    x = x_ref[...]
    pe = pe_ref[...]                      # already cast to x.dtype in the wrapper
    y = x + pe                            # broadcast over the batch (sublane) axis

    if training and p_drop > 0.0:
        ts, b, d = x_ref.shape
        # ---- counter-based PRNG: hash(global_element_index ^ f(seed)) --------
        # Works on TPU (pure VPU integer ops) and in interpret mode; distinct
        # per grid block because the sequence offset enters the index.
        row = lax.broadcasted_iota(jnp.uint32, (ts, b, d), 0)
        col_b = lax.broadcasted_iota(jnp.uint32, (ts, b, d), 1)
        col_d = lax.broadcasted_iota(jnp.uint32, (ts, b, d), 2)
        s_off = (pl.program_id(0) * ts).astype(jnp.uint32)
        idx = ((row + s_off) * jnp.uint32(b) + col_b) * jnp.uint32(d) + col_d

        seed = seed_ref[0].astype(jnp.uint32)
        h = idx ^ (seed * jnp.uint32(0x9E3779B9))
        # lowbias32 finalizer
        h = h ^ (h >> 16)
        h = h * jnp.uint32(0x7FEB352D)
        h = h ^ (h >> 15)
        h = h * jnp.uint32(0x846CA68B)
        h = h ^ (h >> 16)

        # Integer threshold compare: keep iff h < (1 - p) * 2^32.
        keep_threshold = jnp.uint32(
            min(int(round((1.0 - p_drop) * 4294967296.0)), 4294967295)
        )
        keep = h < keep_threshold

        scale = jnp.asarray(1.0 / (1.0 - p_drop), dtype=y.dtype)
        y = jnp.where(keep, y * scale, jnp.zeros_like(y))

    o_ref[...] = y.astype(o_ref.dtype)


def positional_encoding_forward(
    x,
    pe,
    seed: int = 0,
    *,
    p_drop: float = 0.1,
    training: bool = True,
    target_block_bytes: int = 2 * 1024 * 1024,
):
    """x: (S, B, D); pe: (max_len, 1, D). Returns (S, B, D)."""
    S, B, D = x.shape
    pe_slice = pe[:S].astype(x.dtype)                   # pe[:x.size(0), :], x's dtype
    seed_arr = jnp.asarray([seed], dtype=jnp.int32)

    # Tile the sequence axis so each x/out block is ~2 MiB: fits the scoped
    # VMEM budget (with double-buffered in/out) on v5e/v6e/v7x while being
    # large enough to amortize per-grid-step overhead (~0.35 us).
    bytes_per_row = B * D * x.dtype.itemsize
    ts = max(1, target_block_bytes // max(1, bytes_per_row))
    ts = min(ts, S)
    if ts >= 8:
        ts = (ts // 8) * 8
    grid = (pl.cdiv(S, ts),)

    kernel = functools.partial(
        _pe_dropout_kernel, p_drop=float(p_drop), training=bool(training)
    )

    return pl.pallas_call(
        kernel,
        out_shape=jax.ShapeDtypeStruct((S, B, D), x.dtype),
        grid=grid,
        in_specs=[
            pl.BlockSpec(memory_space=pltpu.MemorySpace.SMEM),      # seed scalar
            pl.BlockSpec((ts, B, D), lambda i: (i, 0, 0)),          # x tile
            pl.BlockSpec((ts, 1, D), lambda i: (i, 0, 0)),          # pe tile
        ],
        out_specs=pl.BlockSpec((ts, B, D), lambda i: (i, 0, 0)),
        compiler_params=pltpu.CompilerParams(
            dimension_semantics=("parallel",),
        ),
    )(seed_arr, x, pe_slice)


if __name__ == "__main__":
    # Small shapes consistent with the module: seq=8, batch=2, d_model=32.
    S, B, D = 8, 2, 32
    key = jax.random.PRNGKey(0)
    x = jax.random.normal(key, (S, B, D), dtype=jnp.float32)

    pe = build_positional_table(d_model=D, max_len=150)

    # Eval mode (dropout = identity): must match pure JAX reference.
    out_eval = jax.block_until_ready(
        positional_encoding_forward(x, pe, training=False)
    )
    ref_eval = x + pe[:S]
    assert out_eval.shape == (S, B, D)
    assert jnp.allclose(out_eval, ref_eval, atol=1e-6, rtol=1e-6), "eval-mode mismatch"

    # Training mode (inverted dropout, deterministic given the seed).
    # NOTE: mask statistics match torch semantics (keep prob 1-p, scale 1/(1-p)),
    # but the actual random stream differs from torch's RNG.
    p = 0.1
    out_train = jax.block_until_ready(
        positional_encoding_forward(x, pe, seed=0, p_drop=p, training=True)
    )
    assert out_train.shape == (S, B, D)
    scaled_ref = ref_eval * (1.0 / (1.0 - p))
    is_dropped = jnp.isclose(out_train, 0.0, atol=1e-6)
    is_kept = jnp.isclose(out_train, scaled_ref, atol=1e-5, rtol=1e-5)
    assert bool(jnp.all(is_dropped | is_kept)), "dropout output not {0, scaled} valued"
    keep_frac = float(jnp.mean(is_kept.astype(jnp.float32)))
    assert 0.6 <= keep_frac <= 1.0, f"implausible keep fraction {keep_frac}"

    print("KERNEL_OK")
</pallas_src>

<mosaic_0001>
module attributes {stable_mosaic.version = 11 : i64} {
  func.func @_pe_dropout_kernel(%arg0: i32, %arg1: memref<1xi32, #tpu.memory_space<smem>>, %arg2: memref<8x2x32xf32, #tpu.memory_space<vmem>>, %arg3: memref<8x1x32xf32, #tpu.memory_space<vmem>>, %arg4: memref<8x2x32xf32, #tpu.memory_space<vmem>>) attributes {dimension_semantics = [#tpu.dimension_semantics<parallel>], iteration_bounds = array<i64: 1>, scalar_prefetch = 0 : i64, scratch_operands = 0 : i64, tpu.core_type = #tpu.core_type<tc>, window_params = [{transform_indices = @transform_0, window_bounds = array<i64: 1>}, {transform_indices = @transform_1, window_bounds = array<i64: 8, 2, 32>}, {transform_indices = @transform_2, window_bounds = array<i64: 8, 1, 32>}, {transform_indices = @transform_3, window_bounds = array<i64: 8, 2, 32>}]} {
    %c0 = arith.constant 0 : index
    %c0_0 = arith.constant 0 : index
    %c0_1 = arith.constant 0 : index
    %0 = vector.load %arg2[%c0, %c0_0, %c0_1] : memref<8x2x32xf32, #tpu.memory_space<vmem>>, vector<8x2x32xf32>
    %c0_2 = arith.constant 0 : index
    %c0_3 = arith.constant 0 : index
    %c0_4 = arith.constant 0 : index
    %1 = vector.load %arg3[%c0_2, %c0_3, %c0_4] : memref<8x1x32xf32, #tpu.memory_space<vmem>>, vector<8x1x32xf32>
    %2 = vector.broadcast %1 : vector<8x1x32xf32> to vector<8x2x32xf32>
    %3 = arith.addf %0, %2 : vector<8x2x32xf32>
    %c0_5 = arith.constant 0 : index
    %c0_6 = arith.constant 0 : index
    %c0_7 = arith.constant 0 : index
    %4 = vector.load %arg4[%c0_5, %c0_6, %c0_7] : memref<8x2x32xf32, #tpu.memory_space<vmem>>, vector<8x2x32xf32>
    tpu.vector_store %arg4[%c0_5, %c0_6, %c0_7], %3 {strides = array<i32>} : memref<8x2x32xf32, #tpu.memory_space<vmem>>, vector<8x2x32xf32>,
    return
  }
  func.func @transform_0(%arg0: i32) -> i32 {
    %c0_i32 = arith.constant 0 : i32
    %c0_i32_0 = arith.constant 0 : i32
    return %c0_i32 : i32
  }
  func.func @transform_1(%arg0: i32) -> (i32, i32, i32) {
    %c0_i32 = arith.constant 0 : i32
    %c0_i32_0 = arith.constant 0 : i32
    %c0_i32_1 = arith.constant 0 : i32
    return %arg0, %c0_i32, %c0_i32_0 : i32, i32, i32
  }
  func.func @transform_2(%arg0: i32) -> (i32, i32, i32) {
    %c0_i32 = arith.constant 0 : i32
    %c0_i32_0 = arith.constant 0 : i32
    %c0_i32_1 = arith.constant 0 : i32
    return %arg0, %c0_i32, %c0_i32_0 : i32, i32, i32
  }
  func.func @transform_3(%arg0: i32) -> (i32, i32, i32) {
    %c0_i32 = arith.constant 0 : i32
    %c0_i32_0 = arith.constant 0 : i32
    %c0_i32_1 = arith.constant 0 : i32
    return %arg0, %c0_i32, %c0_i32_0 : i32, i32, i32
  }
}

</mosaic_0001>

<bundles_post_ra>
// kernel: tpu_custom_call.1
= control target key start
LH: loop header
LB: loop body
LE: loop exit
PB: predicated region body
PF: predicated region fallthrough
CT: control target
= control target key end

     0   :  { %9 = vsyncpa [#allocation4], 0  ;;  %s310_s0 = inlined_call_operand.<no memory space> [shape: s32[1], index: 0, kind: input, shape index: {}]   ;;  %s311_s1 = inlined_call_operand.hbm [shape: f32[8,2,32], index: 1, kind: input, shape index: {}]   ;;  %s312_s2 = inlined_call_operand.hbm [shape: f32[8,1,32], index: 2, kind: input, shape index: {}]   ;;  %s313_s3 = inlined_call_operand.hbm [shape: f32[8,2,32], index: 3, kind: output, shape index: {}]  }
   0x1   :  { %10 = vsyncpa [#allocation7], 0 }
   0x2   :  { %11 = vsyncpa [#allocation5], 0  ;;  %s230_s12 = smov [#allocation3]   ;;  %s158_s16 = scalar_lea.hbm %s311_s1, 256 }
   0x3   :  { %s19_s13 = sshll.u32 %s230_s12, 4  ;;  %p159_p0 = scmp.ne.s32.totalorder %s311_s1, %s158_s16  ;;  %s20_s13 = int_to_ptr.vmem [resolvable:$true] %s19_s13 }
   0x4   :  { %p162_p1 = scmp.lt.u32.totalorder %s158_s16, %s311_s1 }
   0x6   :  { %p164_p2 = pnand %p162_p1, %p159_p0 }
   0x8   :  { %167 = shalt.err (!%p164_p2)
}
   0x9   :  { %s168_s20 = scalar_lea.vmem %s20_s13, 256  ;;  %p173_p4 = scmp.lt.s32.totalorder %s20_s13, %s20_s13 }
   0xa   :  { %p169_p3 = scmp.ne.s32.totalorder %s20_s13, %s168_s20  ;;  %p174_p5 = scmp.lt.s32.totalorder %s168_s20, %s168_s20 }
   0xc   :  { %p175_p6 = por %p174_p5, %p173_p4 }
   0xe   :  { %p176_p7 = pnand %p175_p6, %p169_p3 }
  0x10   :  { %179 = shalt.err (!%p176_p7)
}
  0x11   :  { %s231_s21 = smov 32   ;;  %s232_s22 = smov 2  }
  0x12   :  { %25 = dma.hbm_to_vmem [thread:$0]  %s311_s1, 256, %s20_s13, [#allocation4], %s231_s21, %s231_s21, %s232_s22  }
  0x13   :  { %s233_s25 = smov [#allocation6]   ;;  %s180_s29 = scalar_lea.hbm %s312_s2, 128 }
  0x14   :  { %s31_s26 = sshll.u32 %s233_s25, 4  ;;  %p181_p8 = scmp.ne.s32.totalorder %s312_s2, %s180_s29  ;;  %s32_s26 = int_to_ptr.vmem [resolvable:$true] %s31_s26 }
  0x15   :  { %p184_p9 = scmp.lt.u32.totalorder %s180_s29, %s312_s2 }
  0x17   :  { %p186_p10 = pnand %p184_p9, %p181_p8 }
  0x19   :  { %189 = shalt.err (!%p186_p10)
}
  0x1a   :  { %s190_s7 = scalar_lea.vmem %s32_s26, 128  ;;  %p195_p12 = scmp.lt.s32.totalorder %s32_s26, %s32_s26 }
  0x1b   :  { %p191_p11 = scmp.ne.s32.totalorder %s32_s26, %s190_s7  ;;  %p196_p13 = scmp.lt.s32.totalorder %s190_s7, %s190_s7 }
  0x1d   :  { %p197_p0 = por %p196_p13, %p195_p12 }
  0x1f   :  { %p198_p1 = pnand %p197_p0, %p191_p11 }
  0x21   :  { %201 = shalt.err (!%p198_p1)
}
  0x22   :  { %s234_s1 = smov 16   ;;  %s235_s8 = smov 1  }
  0x23   :  { %37 = dma.hbm_to_vmem [thread:$0]  %s312_s2, 128, %s32_s26, [#allocation7], %s234_s1, %s234_s1, %s235_s8  }
  0x24   :  { %224 = dma.done.wait [#allocation4], 256  }
  0x25   :  { %225 = vsyncadd [#allocation4], 4294967040 }
  0x26   :  { %226 = dma.done.wait [#allocation7], 128  }
  0x27   :  { %227 = vsyncadd [#allocation7], 4294967168  ;;  %vm116_vm0 = vcmask 254976   ;;  %s236_s11 = smov [#allocation8]   ;;  %v44_v0 = vld [vmem:[#allocation3] sm:$0x3] }
  0x28   :  { %s284_s12 = sshll.u32 %s236_s11, 4  ;;  %v143_v1 = vld [vmem:[#allocation6] ss:$0 sm:$0xff]  ;;  %v45_v2 = vld [vmem:[#allocation3 + $0x2] sm:$0x3]  ;;  %s131_s12 = int_to_ptr.vmem [resolvable:$true] %s284_s12 }
  0x29   :  { %v108_v3 = vadd.f32 %v143_v1, %v44_v0  ;;  %v144_v4 = vld [vmem:[#allocation6 + $0x1] ss:$0 sm:$0xff]  ;;  %v46_v5 = vld [vmem:[#allocation3 + $0x4] sm:$0x3]  ;;  %v145_v6 = vld [vmem:[#allocation6 + $0x2] ss:$0 sm:$0xff]  ;;  %p207_p3 = scmp.lt.s32.totalorder %s131_s12, %s131_s12 }
  0x2a   :  { %v109_v7 = vadd.f32 %v144_v4, %v45_v2  ;;  %v110_v8 = vadd.f32 %v145_v6, %v46_v5  ;;  %v47_v9 = vld [vmem:[#allocation3 + $0x6] sm:$0x3]  ;;  %v146_v10 = vld [vmem:[#allocation6 + $0x3] ss:$0 sm:$0xff]  ;;  %v48_v11 = vld [vmem:[#allocation3 + $0x8] sm:$0x3] }
  0x2b   :  { %117 = vst.msk [vmem:[#allocation8] sm:$0x3] %vm116_vm0, %v108_v3  ;;  %v111_v12 = vadd.f32 %v146_v10, %v47_v9  ;;  %v147_v13 = vld [vmem:[#allocation6 + $0x4] ss:$0 sm:$0xff]  ;;  %v49_v14 = vld [vmem:[#allocation3 + $0xa] sm:$0x3] }
  0x2c   :  { %v148_v15 = vld [vmem:[#allocation6 + $0x5] ss:$0 sm:$0xff]  ;;  %118 = vst.msk [vmem:[#allocation8 + $0x2] sm:$0x3] %vm116_vm0, %v109_v7  ;;  %119 = vst.msk [vmem:[#allocation8 + $0x4] sm:$0x3] %vm116_vm0, %v110_v8  ;;  %v112_v16 = vadd.f32 %v147_v13, %v48_v11 }
  0x2d   :  { %v113_v17 = vadd.f32 %v148_v15, %v49_v14  ;;  %v50_v18 = vld [vmem:[#allocation3 + $0xc] sm:$0x3]  ;;  %v149_v19 = vld [vmem:[#allocation6 + $0x6] ss:$0 sm:$0xff]  ;;  %v51_v20 = vld [vmem:[#allocation3 + $0xe] sm:$0x3] }
  0x2e   :  { %120 = vst.msk [vmem:[#allocation8 + $0x6] sm:$0x3] %vm116_vm0, %v111_v12  ;;  %v114_v21 = vadd.f32 %v149_v19, %v50_v18  ;;  %v150_v22 = vld [vmem:[#allocation6 + $0x7] ss:$0 sm:$0xff]  ;;  %121 = vst.msk [vmem:[#allocation8 + $0x8] sm:$0x3] %vm116_vm0, %v112_v16 }
  0x2f   :  { %122 = vst.msk [vmem:[#allocation8 + $0xa] sm:$0x3] %vm116_vm0, %v113_v17  ;;  %v115_v23 = vadd.f32 %v150_v22, %v51_v20  ;;  %s202_s2 = scalar_lea.vmem %s131_s12, 256 }
  0x30   :  { %123 = vst.msk [vmem:[#allocation8 + $0xc] sm:$0x3] %vm116_vm0, %v114_v21  ;;  %p203_p2 = scmp.ne.s32.totalorder %s131_s12, %s202_s2  ;;  %p208_p4 = scmp.lt.s32.totalorder %s202_s2, %s202_s2 }
  0x31   :  { %124 = vst.msk [vmem:[#allocation8 + $0xe] sm:$0x3] %vm116_vm0, %v115_v23 }
  0x32   :  { %p209_p5 = por %p208_p4, %p207_p3 }
  0x34   :  { %p210_p6 = pnand %p209_p5, %p203_p2 }
  0x36   :  { %213 = shalt.err (!%p210_p6)
}
  0x37   :  { %s214_s15 = scalar_lea.hbm %s313_s3, 256 }
  0x38   :  { %p215_p7 = scmp.ne.s32.totalorder %s313_s3, %s214_s15  ;;  %p218_p8 = scmp.lt.u32.totalorder %s214_s15, %s313_s3 }
  0x3a   :  { %p220_p9 = pnand %p218_p8, %p215_p7 }
  0x3c   :  { %223 = shalt.err (!%p220_p9)
}
  0x3d   :  { %136 = dma.vmem_to_hbm [thread:$0]  %s131_s12, 256, %s313_s3, [#allocation5], %s231_s21, %s231_s21, %s232_s22  }
  0x3e   :  { %228 = dma.done.wait [#allocation5], 256  }
  0x3f   :  { %229 = vsyncadd [#allocation5], 4294967040 }
  0x40   :  { %140 = vsyncpa [#allocation4], 1 }
  0x41   :  { %141 = vsyncpa [#allocation7], 1 }
  0x42   :  { %142 = vsyncpa [#allocation5], 1 }

</bundles_post_ra>
